<compile_context>
chip_gen: v7x
topology: tpu7x:2x2x1
jax: 0.10.0
libtpu: 0.0.40
codegen_flags: <defaults>
</compile_context>

<pallas_src>
import functools

import jax
import jax.numpy as jnp
from jax import lax
from jax.experimental import pallas as pl
from jax.experimental.pallas import tpu as pltpu


def ge2e_loss_kernel(x_ref, w_ref, per_row_ref, *, S, U):
    """x_ref: (N, E) embeddings (speaker-major rows); w_ref: (1,) f32 in SMEM.

    Writes per_row_ref: (1, N) f32 per-utterance cross-entropy loss.
    """
    N = S * U
    x = x_ref[...].astype(jnp.float32)                                # (N, E)
    E = x.shape[1]

    inv_U = jnp.float32(1.0 / U)
    inv_Um1 = jnp.float32(1.0 / (U - 1))
    eps = jnp.float32(1e-5)

    # --- one-hot speaker masks built from iota compares (no integer div) ----
    # (S, N) mask: used for the segment-sum matmul and (bool) for the logits
    # diagonal select -> keeps the softmax stage in the lane-dense layout.
    spk = lax.broadcasted_iota(jnp.int32, (S, N), 0)
    col = lax.broadcasted_iota(jnp.int32, (S, N), 1)
    lo = spk * U
    is_diag = (col >= lo) & (col < lo + U)                            # (S, N)
    seg_t = is_diag.astype(jnp.float32)                               # (S, N)

    # (N, S) mask: only used once to row-expand the per-speaker sums on the
    # MXU (standard, non-transposed matmul).
    row_idx = lax.broadcasted_iota(jnp.int32, (N, S), 0)
    col_spk = lax.broadcasted_iota(jnp.int32, (N, S), 1)
    lo_r = col_spk * U
    seg = ((row_idx >= lo_r) & (row_idx < lo_r + U)).astype(jnp.float32)

    # --- per-speaker sums via MXU segment-sum matmul -------------------------
    sums = jnp.dot(seg_t, x, preferred_element_type=jnp.float32)      # (S, E)

    # --- inclusive centroids (mean over utterances), exact L2 normalization --
    c_incl = sums * inv_U                                             # (S, E)
    n_incl = jnp.sqrt(jnp.sum(c_incl * c_incl, axis=1, keepdims=True))
    c_incl = c_incl / (n_incl + eps)                                  # (S, E)

    # --- exclusive (leave-one-out) centroids per row, exact L2 normalization -
    sums_row = jnp.dot(seg, sums, preferred_element_type=jnp.float32) # (N, E)
    c_excl = (sums_row - x) * inv_Um1                                 # (N, E)
    n_excl = jnp.sqrt(jnp.sum(c_excl * c_excl, axis=1, keepdims=True))
    c_excl = c_excl / (n_excl + eps)                                  # (N, E)

    # --- similarity matrix in (S, N) layout (lane dim = N, dense) ------------
    sim_cross = jnp.einsum('se,ne->sn', c_incl, x,
                           preferred_element_type=jnp.float32)        # (S, N)
    # Target similarity as a lane-dense (1, N) row via an MXU contraction
    # (avoids a (N,1) -> (1,N) relayout).
    ones_1e = jnp.ones((1, E), dtype=jnp.float32)
    sim_diag = jnp.einsum('oe,ne->on', ones_1e, x * c_excl,
                          preferred_element_type=jnp.float32)         # (1, N)

    # --- scaled logits; bias b cancels in lse - tgt and is dropped -----------
    w = w_ref[0]
    logits = jnp.where(is_diag, sim_diag, sim_cross) * w              # (S, N)
    tgt = sim_diag * w                                                # (1, N)

    # --- softmax cross-entropy per row (reduction over speakers = sublanes) --
    m = jnp.max(logits, axis=0, keepdims=True)                        # (1, N)
    lse = m + jnp.log(jnp.sum(jnp.exp(logits - m), axis=0, keepdims=True))
    per_row_ref[...] = lse - tgt                                      # (1, N)


def ge2e_loss_pallas(embeds, w, b):
    """embeds: (S, U, E) float; w, b: (1,) float32. Returns scalar loss."""
    S, U, E = embeds.shape
    assert U > 1, "utterances_per_speaker must be > 1 (leave-one-out centroid)"
    del b  # cancels exactly in the cross-entropy (log-softmax shift invariance)
    # Flatten in the wrapper (free in XLA) so the kernel stays 2D; keep the
    # input dtype (upcast to f32 happens inside the kernel).
    x2 = embeds.reshape(S * U, E)
    per_row = pl.pallas_call(
        functools.partial(ge2e_loss_kernel, S=S, U=U),
        out_shape=jax.ShapeDtypeStruct((1, S * U), jnp.float32),
        in_specs=[
            pl.BlockSpec(memory_space=pltpu.MemorySpace.VMEM),
            pl.BlockSpec(memory_space=pltpu.MemorySpace.SMEM),
        ],
        out_specs=pl.BlockSpec(memory_space=pltpu.MemorySpace.VMEM),
    )(x2, w.astype(jnp.float32))
    # Final mean over all S*U rows done in the wrapper (lane-dense output).
    return jnp.mean(per_row)


def ge2e_loss_ref(embeds, w, b):
    """Pure-JAX reference mirroring the PyTorch module (exact math)."""
    S, U, E = embeds.shape
    x = embeds.astype(jnp.float32)
    c_incl = jnp.mean(x, axis=1)
    c_incl = c_incl / (jnp.linalg.norm(c_incl, axis=1, keepdims=True) + 1e-5)
    c_excl = (jnp.sum(x, axis=1, keepdims=True) - x) / (U - 1)
    c_excl = c_excl / (jnp.linalg.norm(c_excl, axis=2, keepdims=True) + 1e-5)
    sim_cross = jnp.einsum('iue,je->iuj', x, c_incl)
    sim_diag = jnp.sum(x * c_excl, axis=2)            # (S, U)
    eye = jnp.eye(S, dtype=bool)[:, None, :]          # (S, 1, S)
    sim = jnp.where(eye, sim_diag[:, :, None], sim_cross)
    sim = sim * w[0] + b[0]
    sim = sim.reshape(S * U, S)
    tgt = jnp.repeat(jnp.arange(S), U)
    logits = sim - jax.scipy.special.logsumexp(sim, axis=1, keepdims=True)
    return -jnp.mean(logits[jnp.arange(S * U), tgt])


if __name__ == "__main__":
    # Small shapes consistent with the module: (speakers, utterances, embed_dim)
    S, U, E = 4, 6, 64
    key = jax.random.PRNGKey(0)
    embeds = jax.random.normal(key, (S, U, E), dtype=jnp.float32)

    # Deterministic parameter init per GE2ELoss3.__init__
    w = jnp.array([10.0], dtype=jnp.float32)
    b = jnp.array([-5.0], dtype=jnp.float32)

    loss = ge2e_loss_pallas(embeds, w, b)
    jax.block_until_ready(loss)

    loss_ref = ge2e_loss_ref(embeds, w, b)
    # Exact normalization (no approx reciprocal) -> tight tolerance again.
    assert jnp.allclose(loss, loss_ref, rtol=1e-4, atol=1e-4), (loss, loss_ref)

    print("KERNEL_OK")
</pallas_src>

<mosaic_0001>
module attributes {stable_mosaic.version = 11 : i64} {
  func.func @ge2e_loss_kernel(%arg0: memref<24x64xf32, #tpu.memory_space<vmem>>, %arg1: memref<1xf32, #tpu.memory_space<smem>>, %arg2: memref<1x24xf32, #tpu.memory_space<vmem>>) attributes {dimension_semantics = [], scalar_prefetch = 0 : i64, scratch_operands = 0 : i64, tpu.core_type = #tpu.core_type<tc>} {
    %c0 = arith.constant 0 : index
    %c0_0 = arith.constant 0 : index
    %0 = vector.load %arg0[%c0, %c0_0] : memref<24x64xf32, #tpu.memory_space<vmem>>, vector<24x64xf32>
    %1 = tpu.iota {dimensions = array<i32: 0>} : vector<4x24xi32>
    %2 = tpu.iota {dimensions = array<i32: 1>} : vector<4x24xi32>
    %c6_i32 = arith.constant 6 : i32
    %3 = vector.broadcast %c6_i32 : i32 to vector<4x24xi32>
    %4 = arith.muli %1, %3 : vector<4x24xi32>
    %5 = arith.cmpi sge, %2, %4 : vector<4x24xi32>
    %c6_i32_1 = arith.constant 6 : i32
    %6 = vector.broadcast %c6_i32_1 : i32 to vector<4x24xi32>
    %7 = arith.addi %4, %6 : vector<4x24xi32>
    %8 = arith.cmpi slt, %2, %7 : vector<4x24xi32>
    %9 = arith.andi %5, %8 : vector<4x24xi1>
    %10 = arith.extui %9 : vector<4x24xi1> to vector<4x24xi32>
    %11 = arith.sitofp %10 : vector<4x24xi32> to vector<4x24xf32>
    %12 = tpu.iota {dimensions = array<i32: 0>} : vector<24x4xi32>
    %13 = tpu.iota {dimensions = array<i32: 1>} : vector<24x4xi32>
    %c6_i32_2 = arith.constant 6 : i32
    %14 = vector.broadcast %c6_i32_2 : i32 to vector<24x4xi32>
    %15 = arith.muli %13, %14 : vector<24x4xi32>
    %16 = arith.cmpi sge, %12, %15 : vector<24x4xi32>
    %c6_i32_3 = arith.constant 6 : i32
    %17 = vector.broadcast %c6_i32_3 : i32 to vector<24x4xi32>
    %18 = arith.addi %15, %17 : vector<24x4xi32>
    %19 = arith.cmpi slt, %12, %18 : vector<24x4xi32>
    %20 = arith.andi %16, %19 : vector<24x4xi1>
    %21 = arith.extui %20 : vector<24x4xi1> to vector<24x4xi32>
    %22 = arith.sitofp %21 : vector<24x4xi32> to vector<24x4xf32>
    %cst = arith.constant dense<0.000000e+00> : vector<4x64xf32>
    %23 = tpu.matmul %11, %0, %cst {dimension_numbers = #tpu.dot_dimension_numbers<[1], [0], [0], [1], [0, 0, 1, 1], [], []>} : vector<4x24xf32>, vector<24x64xf32>, vector<4x64xf32> -> vector<4x64xf32>
    %cst_4 = arith.constant 0.166666672 : f32
    %24 = vector.broadcast %cst_4 : f32 to vector<4x64xf32>
    %25 = arith.mulf %23, %24 : vector<4x64xf32>
    %26 = arith.mulf %25, %25 : vector<4x64xf32>
    %cst_5 = arith.constant dense<0.000000e+00> : vector<4xf32>
    %27 = vector.multi_reduction <add>, %26, %cst_5 [1] : vector<4x64xf32> to vector<4xf32>
    %28 = vector.shape_cast %27 : vector<4xf32> to vector<4x1xf32>
    %29 = math.sqrt %28 : vector<4x1xf32>
    %cst_6 = arith.constant 9.99999974E-6 : f32
    %30 = vector.broadcast %cst_6 : f32 to vector<4x1xf32>
    %31 = arith.addf %29, %30 : vector<4x1xf32>
    %32 = vector.broadcast %31 : vector<4x1xf32> to vector<4x64xf32>
    %33 = arith.divf %25, %32 : vector<4x64xf32>
    %cst_7 = arith.constant dense<0.000000e+00> : vector<24x64xf32>
    %34 = tpu.matmul %22, %23, %cst_7 {dimension_numbers = #tpu.dot_dimension_numbers<[1], [0], [0], [1], [0, 0, 1, 1], [], []>} : vector<24x4xf32>, vector<4x64xf32>, vector<24x64xf32> -> vector<24x64xf32>
    %35 = arith.subf %34, %0 : vector<24x64xf32>
    %cst_8 = arith.constant 2.000000e-01 : f32
    %36 = vector.broadcast %cst_8 : f32 to vector<24x64xf32>
    %37 = arith.mulf %35, %36 : vector<24x64xf32>
    %38 = arith.mulf %37, %37 : vector<24x64xf32>
    %cst_9 = arith.constant dense<0.000000e+00> : vector<24xf32>
    %39 = vector.multi_reduction <add>, %38, %cst_9 [1] : vector<24x64xf32> to vector<24xf32>
    %40 = vector.shape_cast %39 : vector<24xf32> to vector<24x1xf32>
    %41 = math.sqrt %40 : vector<24x1xf32>
    %cst_10 = arith.constant 9.99999974E-6 : f32
    %42 = vector.broadcast %cst_10 : f32 to vector<24x1xf32>
    %43 = arith.addf %41, %42 : vector<24x1xf32>
    %44 = vector.broadcast %43 : vector<24x1xf32> to vector<24x64xf32>
    %45 = arith.divf %37, %44 : vector<24x64xf32>
    "tpu.trace_start"() <{level = 10 : i32, message = "se,ne->sn"}> : () -> ()
    %cst_11 = arith.constant dense<0.000000e+00> : vector<4x24xf32>
    %46 = tpu.matmul %33, %0, %cst_11 {dimension_numbers = #tpu.dot_dimension_numbers<[1], [1], [0], [0], [0, 0, 1, 0], [], []>} : vector<4x64xf32>, vector<24x64xf32>, vector<4x24xf32> -> vector<4x24xf32>
    %cst_12 = arith.constant 1.000000e+00 : f32
    "tpu.trace_stop"() : () -> ()
    %47 = vector.broadcast %cst_12 : f32 to vector<1x64xf32>
    %48 = arith.mulf %0, %45 : vector<24x64xf32>
    "tpu.trace_start"() <{level = 10 : i32, message = "oe,ne->on"}> : () -> ()
    %cst_13 = arith.constant dense<0.000000e+00> : vector<1x24xf32>
    %49 = tpu.matmul %47, %48, %cst_13 {dimension_numbers = #tpu.dot_dimension_numbers<[1], [1], [0], [0], [0, 0, 1, 0], [], []>} : vector<1x64xf32>, vector<24x64xf32>, vector<1x24xf32> -> vector<1x24xf32>
    "tpu.trace_stop"() : () -> ()
    %c0_14 = arith.constant 0 : index
    %50 = memref.load %arg1[%c0_14] : memref<1xf32, #tpu.memory_space<smem>>
    %51 = vector.shape_cast %49 : vector<1x24xf32> to vector<1x24xf32>
    %52 = vector.broadcast %51 : vector<1x24xf32> to vector<4x24xf32>
    %53 = arith.select %9, %52, %46 : vector<4x24xi1>, vector<4x24xf32>
    %54 = vector.broadcast %50 : f32 to vector<4x24xf32>
    %55 = arith.mulf %53, %54 : vector<4x24xf32>
    %56 = vector.broadcast %50 : f32 to vector<1x24xf32>
    %57 = arith.mulf %49, %56 : vector<1x24xf32>
    %cst_15 = arith.constant dense<0xFF800000> : vector<24xf32>
    %58 = vector.multi_reduction <maximumf>, %55, %cst_15 [0] : vector<4x24xf32> to vector<24xf32>
    %59 = vector.shape_cast %58 : vector<24xf32> to vector<1x24xf32>
    %60 = vector.broadcast %59 : vector<1x24xf32> to vector<4x24xf32>
    %61 = arith.subf %55, %60 : vector<4x24xf32>
    %62 = math.exp %61 : vector<4x24xf32>
    %cst_16 = arith.constant dense<0.000000e+00> : vector<24xf32>
    %63 = vector.multi_reduction <add>, %62, %cst_16 [0] : vector<4x24xf32> to vector<24xf32>
    %64 = vector.shape_cast %63 : vector<24xf32> to vector<1x24xf32>
    %65 = math.log %64 : vector<1x24xf32>
    %66 = arith.addf %59, %65 : vector<1x24xf32>
    %67 = arith.subf %66, %57 : vector<1x24xf32>
    %c0_17 = arith.constant 0 : index
    %c0_18 = arith.constant 0 : index
    %68 = vector.load %arg2[%c0_17, %c0_18] : memref<1x24xf32, #tpu.memory_space<vmem>>, vector<1x24xf32>
    tpu.vector_store %arg2[%c0_17, %c0_18], %67 {strides = array<i32>} : memref<1x24xf32, #tpu.memory_space<vmem>>, vector<1x24xf32>,
    return
  }
}

</mosaic_0001>

<bundles_post_ra>
// kernel: tpu_custom_call.1
= control target key start
LH: loop header
LB: loop body
LE: loop exit
PB: predicated region body
PF: predicated region fallthrough
CT: control target
= control target key end

     0   :  { %8 = vsyncpa [#allocation4], 0  ;;  %s809_s0 = inlined_call_operand.hbm [shape: f32[24,64], index: 0, kind: input, shape index: {}]   ;;  %s810_s1 = inlined_call_operand.<no memory space> [shape: f32[1], index: 1, kind: input, shape index: {}]   ;;  %s811_s2 = inlined_call_operand.hbm [shape: f32[1,24], index: 2, kind: output, shape index: {}]  }
   0x1   :  { %9 = vsyncpa [#allocation5], 0  ;;  %s666_s9 = smov [#allocation3]   ;;  %s618_s13 = scalar_lea.hbm %s809_s0, 384 }
   0x2   :  { %s15_s10 = sshll.u32 %s666_s9, 4  ;;  %p619_p0 = scmp.ne.s32.totalorder %s809_s0, %s618_s13  ;;  %s16_s10 = int_to_ptr.vmem [resolvable:$true] %s15_s10 }
   0x3   :  { %p622_p1 = scmp.lt.u32.totalorder %s618_s13, %s809_s0 }
   0x5   :  { %p624_p2 = pnand %p622_p1, %p619_p0 }
   0x7   :  { %627 = shalt.err (!%p624_p2)
}
   0x8   :  { %s628_s18 = scalar_lea.vmem %s16_s10, 384  ;;  %p633_p4 = scmp.lt.s32.totalorder %s16_s10, %s16_s10 }
   0x9   :  { %p629_p3 = scmp.ne.s32.totalorder %s16_s10, %s628_s18  ;;  %p634_p5 = scmp.lt.s32.totalorder %s628_s18, %s628_s18 }
   0xb   :  { %p635_p6 = por %p634_p5, %p633_p4 }
   0xd   :  { %p636_p7 = pnand %p635_p6, %p629_p3 }
   0xf   :  { %639 = shalt.err (!%p636_p7)
}
  0x10   :  { %s667_s19 = smov 128   ;;  %s668_s20 = smov 8  }
  0x11   :  { %21 = dma.hbm_to_vmem [thread:$0]  %s809_s0, 384, %s16_s10, [#allocation4], %s667_s19, %s667_s19, %s668_s20  }
  0x12   :  { %662 = dma.done.wait [#allocation4], 384  }
  0x13   :  { %663 = vsyncadd [#allocation4], 4294966912  ;;  %v30_v0 = vlaneseq  ;;  %v669_v1 = vmov 0.0|0.0   ;;  %vm670_vm0 = vmmov 0   ;;  %v671_v2 = vmov 0.0   ;;  %v709_v7 = vld [vmem:[#allocation3] sm:$0xff] }
  0x14   :  { %579 = vmatprep.subr.bf16.mxu0 %v669_v1  ;;  %547 = vmatprep.mubr.msk.f32.mxu0 %vm670_vm0, %v671_v2  ;;  %v711_v8 = vld [vmem:[#allocation3 + $0x8] sm:$0xff]  ;;  %v723_v11 = vld [vmem:[#allocation3 + $0x10] sm:$0xff]  ;;  %vm60_vm4 = vcmask 195584   ;;  %vm160_vm10 = vcmask 1043456   ;;  %vm150_vm11 = vcmask 31744  }
  0x15   :  { %v703_v3 = vshrl.u32 %v30_v0, 7  ;;  %v33_v4 = vand.u32 127, %v30_v0  ;;  %550 = vmatprep.subr.mxu1 %v671_v2  ;;  %552 = vmatprep.mubr.msk.f32.mxu1 %vm670_vm0, %v671_v2  ;;  %v715_v9 = vpack.c.bf16 %v711_v8, %v709_v7 }
  0x17   :  { %v34_v5 = vmul.u32 6, %v703_v3  ;;  %581 = vmatpush3.bf16.msra.mxu0 %v715_v9  ;;  %v43_v13 = vmul.u32 6, %v33_v4  ;;  %v41_v15 = vadd.s32 8, %v703_v3  ;;  %v42_v16 = vadd.s32 16, %v703_v3 }
  0x18   :  { %545 = vmatprep.subr.mxu0 %v671_v2 }
  0x19   :  { %vm35_vm1 = vcmp.ge.s32.totalorder %v33_v4, %v34_v5  ;;  %v36_v6 = vadd.s32 6, %v34_v5  ;;  %v47_v14 = vadd.s32 6, %v43_v13  ;;  %vm44_vm5 = vcmp.ge.s32.totalorder %v703_v3, %v43_v13 }
  0x1a   :  { %vm45_vm8 = vcmp.ge.s32.totalorder %v41_v15, %v43_v13  ;;  %vm46_vm13 = vcmp.ge.s32.totalorder %v42_v16, %v43_v13 }
  0x1b   :  { %vm37_vm2 = vcmp.lt.s32.totalorder %v33_v4, %v36_v6  ;;  %546 = vmatpush3.msra.mxu0 %v723_v11  ;;  %vm48_vm6 = vcmp.lt.s32.totalorder %v703_v3, %v47_v14  ;;  %vm49_vm9 = vcmp.lt.s32.totalorder %v41_v15, %v47_v14  ;;  %vm50_vm14 = vcmp.lt.s32.totalorder %v42_v16, %v47_v14 }
  0x1c   :  { %vm717_vm3 = vmand %vm35_vm1, %vm37_vm2  ;;  %586 = vmatprep.subr.bf16.mxu0 %v669_v1  ;;  %vm253_vm1 = vcmask 523264  }
  0x1d   :  { %v508_v12 = vsel %vm717_vm3, 1.0, %v671_v2  ;;  %vm51_vm7 = vmand %vm44_vm5, %vm48_vm6 }
  0x1e   :  { %548 = vmatmul.mubr.msk.f32.vlgmr.msra.gmra.mrb[0].mxu0 %vm60_vm4, %v508_v12  ;;  %v509_v17 = vsel %vm51_vm7, 1.0, %v671_v2  ;;  %vm52_vm12 = vmand %vm45_vm8, %vm49_vm9 }
  0x1f   :  { %576 = vmatprep.mubr.msk.f32.mxu0 %vm670_vm0, %v671_v2  ;;  %v510_v20 = vsel %vm52_vm12, 1.0, %v671_v2  ;;  %vm53_vm15 = vmand %vm46_vm13, %vm50_vm14  ;;  %vm469_vm12 = vcmask 191488  }
  0x20   :  { %v511_v21 = vsel %vm53_vm15, 1.0, %v671_v2  ;;  %vm768_vm2 = vmpackc.low %vm253_vm1, %vm253_vm1 }
  0xf1   :  { %v130_v18 = vpop.f32.mrb[0].mxu0 }
  0xf2   :  { %v549_v19 = vpop.f32.mrb[1].mxu0  ;;  %551 = vmatpush3.msk.msra.mxu1 %vm160_vm10, %v130_v18  ;;  %v756_v36 = vmul.f32 0.16666667, %v130_v18 }
  0xf3   :  { %553 = vmatmul.mubr.msk.f32.vlgmr.msra.gmra.mrb[0].mxu1 %vm150_vm11, %v509_v17  ;;  %582 = vmatprep.subr.bf16.mxu1 %v669_v1 }
  0xf4   :  { %555 = vmatprep.mubr.msk.f32.mxu1 %vm670_vm0, %v671_v2  ;;  %v135_v41 = vmul.f32 %v756_v36, %v756_v36 }
  0xf7   :  { %556 = vmatmul.mubr.msk.f32.gmra.mrb[2].mxu1 %vm150_vm11, %v510_v20 }
  0xf8   :  { %558 = vmatprep.mubr.msk.f32.mxu1 %vm670_vm0, %v671_v2 }
  0xf9   :  { %585 = vmatpush3.bf16.xpose.msk.msra.mxu1 %vm768_vm2, %v715_v9 }
  0xfa   :  { %565 = vmatprep.subr.mxu1 %v671_v2 }
  0xfb   :  { %559 = vmatmul.mubr.msk.f32.gmra.mrb[4].mxu1 %vm150_vm11, %v511_v21 }
  0xfc   :  { %567 = vmatprep.mubr.msk.f32.mxu1 %vm670_vm0, %v671_v2  ;;  %vm136_vm0 = vcmask 519168  }
  0xfd   :  { %v137_v42 = vsel %vm136_vm0, %v135_v41, 0.0 }
 0x101   :  { %566 = vmatpush3.xpose.msk.msra.mxu1 %vm253_vm1, %v723_v11 }
 0x1c6   :  { %v230_v22 = vpop.f32.mrb[0].mxu1 }
 0x1c7   :  { %v244_v23 = vsub.f32 %v230_v22, %v709_v7  ;;  %v554_v24 = vpop.f32.mrb[1].mxu1 }
 0x1c9   :  { %v745_v25 = vmul.f32 0.2, %v244_v23 }
 0x1ca   :  { %v235_v26 = vpop.f32.mrb[2].mxu1 }
 0x1cb   :  { %v245_v27 = vsub.f32 %v235_v26, %v711_v8  ;;  %v557_v28 = vpop.f32.mrb[3].mxu1  ;;  %v250_v29 = vmul.f32 %v745_v25, %v745_v25 }
 0x1cd   :  { %v750_v30 = vmul.f32 0.2, %v245_v27  ;;  %v254_v31 = vsel %vm253_vm1, %v250_v29, 0.0  ;;  %v463_v27 = vsub.s32 0, %v703_v3 }
 0x1ce   :  { %255 = vadd.xlane.f32.xlu0 %v254_v31  ;;  %v240_v32 = vpop.f32.mrb[4].mxu1  ;;  %v466_v31 = vstv %s810_s1  ;;  %s673_s1 = smov [#allocation6]  }
 0x1cf   :  { %v246_v33 = vsub.f32 %v240_v32, %v723_v11  ;;  %v251_v34 = vmul.f32 %v750_v30, %v750_v30  ;;  %v560_v35 = vpop.f32.mrb[5].mxu1  ;;  %s499_s24 = sshll.u32 %s673_s1, 4  ;;  %s500_s24 = int_to_ptr.vmem [resolvable:$true] %s499_s24 }
 0x1d0   :  { %s640_s25 = scalar_lea.vmem %s500_s24, 16  ;;  %s644_s26 = scalar_lea.vmem %s500_s24, 32 }
 0x1d1   :  { %v758_v37 = vmul.f32 0.2, %v246_v33  ;;  %v257_v38 = vsel %vm253_vm1, %v251_v34, 0.0  ;;  %p641_p8 = scmp.ne.s32.totalorder %s500_s24, %s640_s25  ;;  %p645_p9 = scmp.lt.s32.totalorder %s500_s24, %s500_s24 }
 0x1d2   :  { %258 = vadd.xlane.f32.xlu0 %v257_v38  ;;  %p646_p10 = scmp.lt.s32.totalorder %s644_s26, %s640_s25 }
 0x1d3   :  { %v252_v39 = vmul.f32 %v758_v37, %v758_v37 }
 0x1d4   :  { %p647_p11 = por %p646_p10, %p645_p9 }
 0x1d5   :  { %v260_v40 = vsel %vm253_vm1, %v252_v39, 0.0 }
 0x1d6   :  { %261 = vadd.xlane.f32.xlu1 %v260_v40  ;;  %p648_p12 = pnand %p647_p11, %p641_p8 }
 0x1da   :  { %138 = vadd.xlane.f32.xlu1 %v137_v42 }
 0x25b   :  { %v256_v44 = vpop.xlane.xlu0 %255 }
 0x25c   :  { %598 = vrsqrt.f32 %v256_v44  ;;  %vm265_vm4 = vcmp.eq.f32.partialorder %v256_v44, inf  ;;  %v268_v50 = vand.u32 2147483648, %v256_v44  ;;  %vm267_vm5 = vcmp.eq.f32.partialorder %v256_v44, 0.0 }
 0x25f   :  { %v259_v45 = vpop.xlane.xlu0 %258 }
 0x260   :  { %600 = vrsqrt.f32 %v259_v45  ;;  %vm272_vm6 = vcmp.eq.f32.partialorder %v259_v45, inf  ;;  %v275_v56 = vand.u32 2147483648, %v259_v45  ;;  %vm274_vm7 = vcmp.eq.f32.partialorder %v259_v45, 0.0 }
 0x263   :  { %v262_v46 = vpop.xlane.xlu1 %261 }
 0x264   :  { %602 = vrsqrt.f32 %v262_v46  ;;  %vm279_vm8 = vcmp.eq.f32.partialorder %v262_v46, inf  ;;  %v282_v62 = vand.u32 2147483648, %v262_v46  ;;  %vm281_vm9 = vcmp.eq.f32.partialorder %v262_v46, 0.0 }
 0x266   :  { %v599_v47 = vpop.eup %598 }
 0x267   :  { %v264_v48 = vmul.f32 %v599_v47, %v256_v44  ;;  %v139_v49 = vpop.xlane.xlu1 %138 }
 0x268   :  { %604 = vrsqrt.f32 %v139_v49  ;;  %vm142_vm10 = vcmp.eq.f32.partialorder %v139_v49, inf  ;;  %v145_v6 = vand.u32 2147483648, %v139_v49  ;;  %vm144_vm11 = vcmp.eq.f32.partialorder %v139_v49, 0.0 }
 0x269   :  { %v266_v51 = vsel %vm265_vm4, %v256_v44, %v264_v48 }
 0x26a   :  { %v601_v52 = vpop.eup %600  ;;  %v269_v53 = vsel %vm267_vm5, %v268_v50, %v266_v51 }
 0x26b   :  { %v284_v54 = vadd.f32 1e-05, %v269_v53  ;;  %v271_v55 = vmul.f32 %v601_v52, %v259_v45 }
 0x26d   :  { %606 = vrcp.f32 %v284_v54  ;;  %v273_v57 = vsel %vm272_vm6, %v259_v45, %v271_v55 }
 0x26e   :  { %v603_v58 = vpop.eup %602  ;;  %v276_v59 = vsel %vm274_vm7, %v275_v56, %v273_v57 }
 0x26f   :  { %v285_v60 = vadd.f32 1e-05, %v276_v59  ;;  %v278_v61 = vmul.f32 %v603_v58, %v262_v46 }
 0x271   :  { %608 = vrcp.f32 %v285_v60  ;;  %v280_v63 = vsel %vm279_vm8, %v262_v46, %v278_v61 }
 0x272   :  { %v605_v0 = vpop.eup %604  ;;  %v283_v1 = vsel %vm281_vm9, %v282_v62, %v280_v63 }
 0x273   :  { %v286_v4 = vadd.f32 1e-05, %v283_v1  ;;  %v141_v5 = vmul.f32 %v605_v0, %v139_v49 }
 0x275   :  { %v143_v9 = vsel %vm142_vm10, %v139_v49, %v141_v5  ;;  %610 = vrcp.f32 %v286_v4 }
 0x276   :  { %v146_v12 = vsel %vm144_vm11, %v145_v6, %v143_v9 }
 0x277   :  { %v607_v13 = vpop.eup %606  ;;  %v147_v14 = vadd.f32 1e-05, %v146_v12 }
 0x278   :  { %v288_v15 = vmul.f32 %v607_v13, %v745_v25 }
 0x279   :  { %612 = vrcp.f32 %v147_v14 }
 0x27a   :  { %v375_v18 = vmul.f32 %v288_v15, %v709_v7  ;;  %v672_v7 = vmov 1.0  }
 0x27b   :  { %v609_v16 = vpop.eup %608 }
 0x27c   :  { %v290_v17 = vmul.f32 %v609_v16, %v750_v30 }
 0x27e   :  { %v376_v19 = vmul.f32 %v290_v17, %v711_v8 }
 0x27f   :  { %v611_v21 = vpop.eup %610 }
 0x280   :  { %v587_v20 = vpack.c.bf16 %v376_v19, %v375_v18  ;;  %v292_v24 = vmul.f32 %v611_v21, %v758_v37 }
 0x282   :  { %589 = vmatpush3.bf16.xpose.msk.msra.mxu0 %vm768_vm2, %v587_v20  ;;  %v377_v25 = vmul.f32 %v292_v24, %v723_v11 }
 0x283   :  { %v613_v22 = vpop.eup %612  ;;  %574 = vmatprep.subr.mxu0 %v671_v2 }
 0x284   :  { %v149_v23 = vmul.f32 %v613_v22, %v756_v36 }
 0x286   :  { %568 = vmatmul.mubr.msk.f32.vlgmr.msra.gmra.mrb[6].mxu1 %vm253_vm1, %v149_v23 }
 0x28a   :  { %575 = vmatpush3.xpose.msk.msra.mxu0 %vm253_vm1, %v377_v25 }
 0x28d   :  { %577 = vmatmul.mubr.msk.f32.vlgmr.msra.gmra.mrb[2].mxu0 %vm253_vm1, %v672_v7 }
 0x359   :  { %v371_v8 = vpop.f32.mrb[6].mxu1 }
 0x35a   :  { %v569_v26 = vpop.f32.mrb[7].mxu1 }
 0x360   :  { %v456_v28 = vpop.f32.mrb[2].mxu0 }
 0x361   :  { %v464_v29 = vrot.slane %v456_v28, %v463_v27  ;;  %v578_v2 = vpop.f32.mrb[3].mxu0  ;;  %v468_v49 = vmul.f32 %v466_v31, %v456_v28 }
 0x363   :  { %v465_v30 = vsel %vm717_vm3, %v464_v29, %v371_v8  ;;  %vm491_vm3 = vcmask 188416  }
 0x364   :  { %v467_v11 = vmul.f32 %v466_v31, %v465_v30 }
 0x366   :  { %v470_v32 = vsel %vm469_vm12, %v467_v11, -inf }
 0x367   :  { %v471_v33 = vrot.slane %v470_v32, 4 }
 0x369   :  { %v472_v34 = vmax.f32 %v470_v32, %v471_v33 }
 0x36b   :  { %v473_v35 = vrot.slane %v472_v34, 2 }
 0x36d   :  { %v474_v36 = vmax.f32 %v472_v34, %v473_v35 }
 0x36f   :  { %v475_v37 = vrot.slane %v474_v36, 1 }
 0x371   :  { %v476_v38 = vmax.f32 %v474_v36, %v475_v37 }
 0x373   :  { %v477_v3 = vsub.f32 %v467_v11, %v476_v38 }
 0x375   :  { %v478_v39 = vmul.f32 1.442695, %v477_v3 }
 0x377   :  { %614 = vpow2.f32 %v478_v39 }
 0x381   :  { %v615_v40 = vpop.eup %614 }
 0x382   :  { %v480_v41 = vsel %vm469_vm12, %v615_v40, 0.0 }
 0x383   :  { %v481_v10 = vrot.slane %v480_v41, 4 }
 0x385   :  { %v482_v42 = vadd.f32 %v481_v10, %v480_v41 }
 0x387   :  { %v483_v43 = vrot.slane %v482_v42, 2 }
 0x389   :  { %v484_v44 = vadd.f32 %v483_v43, %v482_v42 }
 0x38b   :  { %v485_v45 = vrot.slane %v484_v44, 1 }
 0x38d   :  { %v486_v46 = vadd.f32 %v485_v45, %v484_v44 }
 0x38f   :  { %616 = vlog2.f32 %v486_v46 }
 0x399   :  { %v617_v47 = vpop.eup %616 }
 0x39a   :  { %v488_v48 = vmul.f32 0.6931472, %v617_v47 }
 0x39c   :  { %v489_v50 = vadd.f32 %v488_v48, %v476_v38 }
 0x39e   :  { %v490_v51 = vsub.f32 %v489_v50, %v468_v49 }
 0x3a0   :  { %492 = vst.msk [vmem:[#allocation6] sm:$0x1] %vm491_vm3, %v490_v51 }
 0x3a1   :  { %651 = shalt.err (!%p648_p12)
}
 0x3a2   :  { %s652_s29 = scalar_lea.hbm %s811_s2, 16 }
 0x3a3   :  { %p653_p13 = scmp.ne.s32.totalorder %s811_s2, %s652_s29  ;;  %p656_p0 = scmp.lt.u32.totalorder %s652_s29, %s811_s2 }
 0x3a5   :  { %p658_p1 = pnand %p656_p0, %p653_p13 }
 0x3a7   :  { %661 = shalt.err (!%p658_p1)
}
 0x3a8   :  { %502 = dma.vmem_to_hbm [thread:$0]  %s500_s24, 16, %s811_s2, [#allocation5]  }
 0x3a9   :  { %664 = dma.done.wait [#allocation5], 16  }
 0x3aa   :  { %665 = vsyncadd [#allocation5], 4294967280 }
 0x3ab   :  { %506 = vsyncpa [#allocation4], 1 }
 0x3ac   :  { %507 = vsyncpa [#allocation5], 1 }

</bundles_post_ra>
